<compile_context>
chip_gen: v7x
topology: tpu7x:2x2x1
jax: 0.10.0
libtpu: 0.0.40
codegen_flags: <defaults>
</compile_context>

<pallas_src>
import math

import jax
import jax.numpy as jnp
from jax import lax
from jax.experimental import pallas as pl
from jax.experimental.pallas import tpu as pltpu

# Contract the In axis of x (B, In) with the In axis of W (Out, In)  ->  (B, Out).
_DN = (((1,), (1,)), ((), ()))


# ----------------------------------------------------------------------------
# Pallas kernels
# ----------------------------------------------------------------------------
def _noisy_linear_kernel(x_ref, wmu_ref, wsig_ref, ein_ref, eout_ref,
                         bmu_ref, bsig_ref, o_ref, acc_ref):
    """Training path: y = x@mu^T + eps_out * ((x*eps_in)@sigma^T) + b_eff."""
    k = pl.program_id(2)

    @pl.when(k == 0)
    def _():
        acc_ref[...] = jnp.zeros_like(acc_ref)

    x = x_ref[...]                                   # (tm, tk) stream dtype
    xn = x * ein_ref[...]                            # rank-1 noise folded into activations
    acc = lax.dot_general(x, wmu_ref[...], _DN,
                          preferred_element_type=jnp.float32)
    acc += eout_ref[...] * lax.dot_general(xn, wsig_ref[...], _DN,
                                           preferred_element_type=jnp.float32)
    acc_ref[...] += acc

    @pl.when(k == pl.num_programs(2) - 1)
    def _():
        b = bmu_ref[...] + bsig_ref[...] * eout_ref[...]     # (1, tn) f32
        o_ref[...] = (acc_ref[...] + b).astype(o_ref.dtype)


def _mu_linear_kernel(x_ref, wmu_ref, bmu_ref, o_ref, acc_ref):
    """Eval path: plain y = x @ mu^T + b_mu (no noise streams at all)."""
    k = pl.program_id(2)

    @pl.when(k == 0)
    def _():
        acc_ref[...] = jnp.zeros_like(acc_ref)

    acc_ref[...] += lax.dot_general(x_ref[...], wmu_ref[...], _DN,
                                    preferred_element_type=jnp.float32)

    @pl.when(k == pl.num_programs(2) - 1)
    def _():
        o_ref[...] = (acc_ref[...] + bmu_ref[...]).astype(o_ref.dtype)


# ----------------------------------------------------------------------------
# Wrapper
# ----------------------------------------------------------------------------
def _round_up(x, m):
    return ((x + m - 1) // m) * m


def _pick_tile(dim, preferred, align):
    """Largest multiple of `align` that divides `dim` (a multiple of align), <= preferred."""
    t = max(align, (min(preferred, dim) // align) * align)
    while dim % t:
        t -= align
    return t


def _pad2(a, rows, cols):
    pr, pc = rows - a.shape[0], cols - a.shape[1]
    if pr == 0 and pc == 0:
        return a
    return jnp.pad(a, ((0, pr), (0, pc)))


def noisy_linear_forward(x, weight_mu, weight_sigma, bias_mu, bias_sigma,
                         eps_in=None, eps_out=None, *,
                         stream_dtype=jnp.float32, out_dtype=jnp.float32,
                         tm=256, tn=256, tk=512):
    """NoisyLinear forward.

    x: (B, In). weight_*: (Out, In) (PyTorch layout, never transposed on host).
    bias_*: (Out,). eps_in: (In,), eps_out: (Out,) — rank-1 noise factors
    (the (Out, In) outer product is never materialized).
    eps_in/eps_out == None -> eval (mu-only) path.
    """
    B, In = x.shape
    Out = weight_mu.shape[0]
    training = eps_in is not None

    # Pad: B -> multiple of 8 (f32 sublane), In/Out -> multiples of 128 (lane-dense).
    Bp, Inp, Outp = _round_up(B, 8), _round_up(In, 128), _round_up(Out, 128)

    xp = _pad2(x.astype(stream_dtype), Bp, Inp)
    wmu = _pad2(weight_mu.astype(stream_dtype), Outp, Inp)
    bmu = _pad2(bias_mu.reshape(1, Out).astype(jnp.float32), 1, Outp)

    tm_ = _pick_tile(Bp, tm, 8)
    tn_ = _pick_tile(Outp, tn, 128)
    tk_ = _pick_tile(Inp, tk, 128)
    grid = (Bp // tm_, Outp // tn_, Inp // tk_)

    x_spec = pl.BlockSpec((tm_, tk_), lambda i, j, k: (i, k))
    w_spec = pl.BlockSpec((tn_, tk_), lambda i, j, k: (j, k))
    col_spec = pl.BlockSpec((1, tn_), lambda i, j, k: (0, j))   # per-Out row vectors
    row_spec = pl.BlockSpec((1, tk_), lambda i, j, k: (0, k))   # per-In row vectors
    o_spec = pl.BlockSpec((tm_, tn_), lambda i, j, k: (i, j))
    scratch = [pltpu.VMEM((tm_, tn_), jnp.float32)]

    cparams = pltpu.CompilerParams(
        dimension_semantics=("parallel", "parallel", "arbitrary"),
        vmem_limit_bytes=32 * 1024 * 1024)

    if training:
        wsig = _pad2(weight_sigma.astype(stream_dtype), Outp, Inp)
        ein = _pad2(eps_in.reshape(1, In).astype(stream_dtype), 1, Inp)
        eout = _pad2(eps_out.reshape(1, Out).astype(jnp.float32), 1, Outp)
        bsig = _pad2(bias_sigma.reshape(1, Out).astype(jnp.float32), 1, Outp)

        out = pl.pallas_call(
            _noisy_linear_kernel,
            out_shape=jax.ShapeDtypeStruct((Bp, Outp), out_dtype),
            grid_spec=pltpu.PrefetchScalarGridSpec(
                num_scalar_prefetch=0, grid=grid,
                in_specs=[x_spec, w_spec, w_spec, row_spec, col_spec, col_spec, col_spec],
                out_specs=o_spec,
                scratch_shapes=scratch),
            compiler_params=cparams,
        )(xp, wmu, wsig, ein, eout, bmu, bsig)
    else:
        out = pl.pallas_call(
            _mu_linear_kernel,
            out_shape=jax.ShapeDtypeStruct((Bp, Outp), out_dtype),
            grid_spec=pltpu.PrefetchScalarGridSpec(
                num_scalar_prefetch=0, grid=grid,
                in_specs=[x_spec, w_spec, col_spec],
                out_specs=o_spec,
                scratch_shapes=scratch),
            compiler_params=cparams,
        )(xp, wmu, bmu)

    return out[:B, :Out]


# ----------------------------------------------------------------------------
# Parameter init / factorized noise (plain JAX glue, mirrors the PyTorch module)
# ----------------------------------------------------------------------------
def init_noisy_linear_params(key, in_features, out_features, sigma_init=0.5):
    mu_range = 1.0 / math.sqrt(in_features)
    k1, k2 = jax.random.split(key)
    return dict(
        weight_mu=jax.random.uniform(k1, (out_features, in_features), jnp.float32,
                                     -mu_range, mu_range),
        weight_sigma=jnp.full((out_features, in_features),
                              sigma_init / math.sqrt(in_features), jnp.float32),
        bias_mu=jax.random.uniform(k2, (out_features,), jnp.float32,
                                   -mu_range, mu_range),
        bias_sigma=jnp.full((out_features,),
                            sigma_init / math.sqrt(out_features), jnp.float32),
    )


def _scale_noise(key, size):
    v = jax.random.normal(key, (size,), jnp.float32)
    return jnp.sign(v) * jnp.sqrt(jnp.abs(v))


def reset_noise(key, in_features, out_features):
    """Factorized-Gaussian noise: returns only the rank-1 factors (eps_in, eps_out)."""
    k_in, k_out = jax.random.split(key)
    return _scale_noise(k_in, in_features), _scale_noise(k_out, out_features)


def noisy_linear_apply(params, x, noise_key=None, training=True,
                       stream_dtype=jnp.float32):
    out_features, in_features = params["weight_mu"].shape
    if training:
        eps_in, eps_out = reset_noise(noise_key, in_features, out_features)
    else:
        eps_in = eps_out = None          # mu-only path, no noise traffic
    return noisy_linear_forward(
        x, params["weight_mu"], params["weight_sigma"],
        params["bias_mu"], params["bias_sigma"],
        eps_in, eps_out, stream_dtype=stream_dtype)


# ----------------------------------------------------------------------------
if __name__ == "__main__":
    in_features, out_features, batch = 256, 128, 8   # lane/sublane-aligned demo sizes

    root = jax.random.PRNGKey(0)
    k_param, k_x, k_noise, k_param2, k_x2, k_noise2 = jax.random.split(root, 6)

    params = init_noisy_linear_params(k_param, in_features, out_features)
    x = jax.random.normal(k_x, (batch, in_features), jnp.float32)
    eps_in, eps_out = reset_noise(k_noise, in_features, out_features)

    # Training forward (noisy weights), eval forward (mu-only kernel),
    # and a bf16-stream training forward (f32 MXU accumulation).
    y_train = jax.block_until_ready(
        noisy_linear_apply(params, x, k_noise, training=True))
    y_eval = jax.block_until_ready(
        noisy_linear_apply(params, x, training=False))
    y_bf16 = jax.block_until_ready(
        noisy_linear_apply(params, x, k_noise, training=True,
                           stream_dtype=jnp.bfloat16))

    # ---- references (tolerances allow for MXU f32-decomposition differences) ----
    def ref_noisy(xx, p, ein, eout):
        w_eff = p["weight_mu"] + p["weight_sigma"] * jnp.outer(eout, ein)
        b_eff = p["bias_mu"] + p["bias_sigma"] * eout
        return jnp.matmul(xx, w_eff.T, precision="highest") + b_eff

    def ref_mu(xx, p):
        return jnp.matmul(xx, p["weight_mu"].T, precision="highest") + p["bias_mu"]

    def ref_noisy_bf16(xx, p, ein, eout):
        xb = xx.astype(jnp.bfloat16)
        xnb = (xb * ein.astype(jnp.bfloat16)).astype(jnp.float32)
        xb = xb.astype(jnp.float32)
        wmu_b = p["weight_mu"].astype(jnp.bfloat16).astype(jnp.float32)
        wsig_b = p["weight_sigma"].astype(jnp.bfloat16).astype(jnp.float32)
        y = (jnp.matmul(xb, wmu_b.T, precision="highest")
             + eout[None, :] * jnp.matmul(xnb, wsig_b.T, precision="highest"))
        return y + (p["bias_mu"] + p["bias_sigma"] * eout)[None, :]

    assert y_train.shape == (batch, out_features)
    assert jnp.allclose(y_train, ref_noisy(x, params, eps_in, eps_out),
                        atol=1e-2, rtol=1e-2)
    assert jnp.allclose(y_eval, ref_mu(x, params), atol=1e-2, rtol=1e-2)
    assert jnp.allclose(y_bf16, ref_noisy_bf16(x, params, eps_in, eps_out),
                        atol=2e-2, rtol=2e-2)

    # ---- unaligned shapes exercise the padding path ----
    p2 = init_noisy_linear_params(k_param2, 96, 100)
    x2 = jax.random.normal(k_x2, (5, 96), jnp.float32)
    ein2, eout2 = reset_noise(k_noise2, 96, 100)
    y2 = jax.block_until_ready(
        noisy_linear_forward(x2, p2["weight_mu"], p2["weight_sigma"],
                             p2["bias_mu"], p2["bias_sigma"], ein2, eout2))
    assert y2.shape == (5, 100)
    assert jnp.allclose(y2, ref_noisy(x2, p2, ein2, eout2), atol=1e-2, rtol=1e-2)

    print("KERNEL_OK")
</pallas_src>

<mosaic_0001>
module attributes {stable_mosaic.version = 11 : i64} {
  func.func @_noisy_linear_kernel(%arg0: i32, %arg1: i32, %arg2: i32, %arg3: memref<8x256xf32, #tpu.memory_space<vmem>>, %arg4: memref<128x256xf32, #tpu.memory_space<vmem>>, %arg5: memref<128x256xf32, #tpu.memory_space<vmem>>, %arg6: memref<1x256xf32, #tpu.memory_space<vmem>>, %arg7: memref<1x128xf32, #tpu.memory_space<vmem>>, %arg8: memref<1x128xf32, #tpu.memory_space<vmem>>, %arg9: memref<1x128xf32, #tpu.memory_space<vmem>>, %arg10: memref<8x128xf32, #tpu.memory_space<vmem>>, %arg11: memref<8x128xf32, #tpu.memory_space<vmem>>) attributes {dimension_semantics = [#tpu.dimension_semantics<parallel>, #tpu.dimension_semantics<parallel>, #tpu.dimension_semantics<arbitrary>], iteration_bounds = array<i64: 1, 1, 1>, scalar_prefetch = 0 : i64, scratch_operands = 1 : i64, tpu.core_type = #tpu.core_type<tc>, window_params = [{transform_indices = @transform_0, window_bounds = array<i64: 8, 256>}, {transform_indices = @transform_1, window_bounds = array<i64: 128, 256>}, {transform_indices = @transform_2, window_bounds = array<i64: 128, 256>}, {transform_indices = @transform_3, window_bounds = array<i64: 1, 256>}, {transform_indices = @transform_4, window_bounds = array<i64: 1, 128>}, {transform_indices = @transform_5, window_bounds = array<i64: 1, 128>}, {transform_indices = @transform_6, window_bounds = array<i64: 1, 128>}, {transform_indices = @transform_7, window_bounds = array<i64: 8, 128>}]} {
    %c0_i32 = arith.constant 0 : i32
    %0 = arith.cmpi eq, %arg2, %c0_i32 : i32
    %1 = arith.extui %0 : i1 to i32
    %c0_i32_0 = arith.constant 0 : i32
    %2 = arith.cmpi ne, %1, %c0_i32_0 : i32
    scf.if %2 {
      %cst_17 = arith.constant 0.000000e+00 : f32
      %21 = vector.broadcast %cst_17 : f32 to vector<8x128xf32>
      %c0_18 = arith.constant 0 : index
      %c0_19 = arith.constant 0 : index
      %22 = vector.load %arg11[%c0_18, %c0_19] : memref<8x128xf32, #tpu.memory_space<vmem>>, vector<8x128xf32>
      tpu.vector_store %arg11[%c0_18, %c0_19], %21 {strides = array<i32>} : memref<8x128xf32, #tpu.memory_space<vmem>>, vector<8x128xf32>,
    } else {
    }
    %c0 = arith.constant 0 : index
    %c0_1 = arith.constant 0 : index
    %3 = vector.load %arg3[%c0, %c0_1] : memref<8x256xf32, #tpu.memory_space<vmem>>, vector<8x256xf32>
    %c0_2 = arith.constant 0 : index
    %c0_3 = arith.constant 0 : index
    %4 = vector.load %arg6[%c0_2, %c0_3] : memref<1x256xf32, #tpu.memory_space<vmem>>, vector<1x256xf32>
    %5 = vector.broadcast %4 : vector<1x256xf32> to vector<8x256xf32>
    %6 = arith.mulf %3, %5 : vector<8x256xf32>
    %c0_4 = arith.constant 0 : index
    %c0_5 = arith.constant 0 : index
    %7 = vector.load %arg4[%c0_4, %c0_5] : memref<128x256xf32, #tpu.memory_space<vmem>>, vector<128x256xf32>
    %cst = arith.constant dense<0.000000e+00> : vector<8x128xf32>
    %8 = tpu.matmul %3, %7, %cst {dimension_numbers = #tpu.dot_dimension_numbers<[1], [1], [0], [0], [0, 0, 1, 0], [], []>} : vector<8x256xf32>, vector<128x256xf32>, vector<8x128xf32> -> vector<8x128xf32>
    %c0_6 = arith.constant 0 : index
    %c0_7 = arith.constant 0 : index
    %9 = vector.load %arg7[%c0_6, %c0_7] : memref<1x128xf32, #tpu.memory_space<vmem>>, vector<1x128xf32>
    %c0_8 = arith.constant 0 : index
    %c0_9 = arith.constant 0 : index
    %10 = vector.load %arg5[%c0_8, %c0_9] : memref<128x256xf32, #tpu.memory_space<vmem>>, vector<128x256xf32>
    %cst_10 = arith.constant dense<0.000000e+00> : vector<8x128xf32>
    %11 = tpu.matmul %6, %10, %cst_10 {dimension_numbers = #tpu.dot_dimension_numbers<[1], [1], [0], [0], [0, 0, 1, 0], [], []>} : vector<8x256xf32>, vector<128x256xf32>, vector<8x128xf32> -> vector<8x128xf32>
    %12 = vector.broadcast %9 : vector<1x128xf32> to vector<8x128xf32>
    %13 = arith.mulf %12, %11 : vector<8x128xf32>
    %14 = arith.addf %8, %13 : vector<8x128xf32>
    %c0_11 = arith.constant 0 : index
    %c0_12 = arith.constant 0 : index
    %15 = vector.load %arg11[%c0_11, %c0_12] : memref<8x128xf32, #tpu.memory_space<vmem>>, vector<8x128xf32>
    %16 = arith.addf %15, %14 : vector<8x128xf32>
    %c0_13 = arith.constant 0 : index
    %c0_14 = arith.constant 0 : index
    %17 = vector.load %arg11[%c0_13, %c0_14] : memref<8x128xf32, #tpu.memory_space<vmem>>, vector<8x128xf32>
    tpu.vector_store %arg11[%c0_13, %c0_14], %16 {strides = array<i32>} : memref<8x128xf32, #tpu.memory_space<vmem>>, vector<8x128xf32>,
    %c0_i32_15 = arith.constant 0 : i32
    %18 = arith.cmpi eq, %arg2, %c0_i32_15 : i32
    %19 = arith.extui %18 : i1 to i32
    %c0_i32_16 = arith.constant 0 : i32
    %20 = arith.cmpi ne, %19, %c0_i32_16 : i32
    scf.if %20 {
      %c0_17 = arith.constant 0 : index
      %c0_18 = arith.constant 0 : index
      %21 = vector.load %arg8[%c0_17, %c0_18] : memref<1x128xf32, #tpu.memory_space<vmem>>, vector<1x128xf32>
      %c0_19 = arith.constant 0 : index
      %c0_20 = arith.constant 0 : index
      %22 = vector.load %arg9[%c0_19, %c0_20] : memref<1x128xf32, #tpu.memory_space<vmem>>, vector<1x128xf32>
      %c0_21 = arith.constant 0 : index
      %c0_22 = arith.constant 0 : index
      %23 = vector.load %arg7[%c0_21, %c0_22] : memref<1x128xf32, #tpu.memory_space<vmem>>, vector<1x128xf32>
      %24 = arith.mulf %22, %23 : vector<1x128xf32>
      %25 = arith.addf %21, %24 : vector<1x128xf32>
      %c0_23 = arith.constant 0 : index
      %c0_24 = arith.constant 0 : index
      %26 = vector.load %arg11[%c0_23, %c0_24] : memref<8x128xf32, #tpu.memory_space<vmem>>, vector<8x128xf32>
      %27 = vector.broadcast %25 : vector<1x128xf32> to vector<8x128xf32>
      %28 = arith.addf %26, %27 : vector<8x128xf32>
      %c0_25 = arith.constant 0 : index
      %c0_26 = arith.constant 0 : index
      %29 = vector.load %arg10[%c0_25, %c0_26] : memref<8x128xf32, #tpu.memory_space<vmem>>, vector<8x128xf32>
      tpu.vector_store %arg10[%c0_25, %c0_26], %28 {strides = array<i32>} : memref<8x128xf32, #tpu.memory_space<vmem>>, vector<8x128xf32>,
    } else {
    }
    return
  }
  func.func @transform_0(%arg0: i32, %arg1: i32, %arg2: i32) -> (i32, i32) {
    %c0_i32 = arith.constant 0 : i32
    return %arg0, %arg2 : i32, i32
  }
  func.func @transform_1(%arg0: i32, %arg1: i32, %arg2: i32) -> (i32, i32) {
    %c0_i32 = arith.constant 0 : i32
    return %arg1, %arg2 : i32, i32
  }
  func.func @transform_2(%arg0: i32, %arg1: i32, %arg2: i32) -> (i32, i32) {
    %c0_i32 = arith.constant 0 : i32
    return %arg1, %arg2 : i32, i32
  }
  func.func @transform_3(%arg0: i32, %arg1: i32, %arg2: i32) -> (i32, i32) {
    %c0_i32 = arith.constant 0 : i32
    %c0_i32_0 = arith.constant 0 : i32
    return %c0_i32, %arg2 : i32, i32
  }
  func.func @transform_4(%arg0: i32, %arg1: i32, %arg2: i32) -> (i32, i32) {
    %c0_i32 = arith.constant 0 : i32
    %c0_i32_0 = arith.constant 0 : i32
    return %c0_i32, %arg1 : i32, i32
  }
  func.func @transform_5(%arg0: i32, %arg1: i32, %arg2: i32) -> (i32, i32) {
    %c0_i32 = arith.constant 0 : i32
    %c0_i32_0 = arith.constant 0 : i32
    return %c0_i32, %arg1 : i32, i32
  }
  func.func @transform_6(%arg0: i32, %arg1: i32, %arg2: i32) -> (i32, i32) {
    %c0_i32 = arith.constant 0 : i32
    %c0_i32_0 = arith.constant 0 : i32
    return %c0_i32, %arg1 : i32, i32
  }
  func.func @transform_7(%arg0: i32, %arg1: i32, %arg2: i32) -> (i32, i32) {
    %c0_i32 = arith.constant 0 : i32
    return %arg0, %arg1 : i32, i32
  }
}

</mosaic_0001>

<bundles_post_ra>
// kernel: tpu_custom_call.1
= control target key start
LH: loop header
LB: loop body
LE: loop exit
PB: predicated region body
PF: predicated region fallthrough
CT: control target
= control target key end

     0   :  { %12 = vsyncpa [#allocation4], 0  ;;  %s623_s0 = inlined_call_operand.hbm [shape: f32[8,256], index: 0, kind: input, shape index: {}]   ;;  %s624_s1 = inlined_call_operand.hbm [shape: f32[128,256], index: 1, kind: input, shape index: {}]   ;;  %s625_s2 = inlined_call_operand.hbm [shape: f32[128,256], index: 2, kind: input, shape index: {}]   ;;  %s626_s3 = inlined_call_operand.vmem [shape: f32[1,256], index: 3, kind: input, shape index: {}]   ;;  %s627_s4 = inlined_call_operand.vmem [shape: f32[1,128], index: 4, kind: input, shape index: {}]   ;;  %s628_s5 = inlined_call_operand.vmem [shape: f32[1,128], index: 5, kind: input, shape index: {}]   ;;  %s629_s6 = inlined_call_operand.vmem [shape: f32[1,128], index: 6, kind: input, shape index: {}]   ;;  %s630_s7 = inlined_call_operand.hbm [shape: f32[8,128], index: 7, kind: output, shape index: {}]  }
   0x1   :  { %13 = vsyncpa [#allocation7], 0 }
   0x2   :  { %14 = vsyncpa [#allocation5], 0  ;;  %s500_s24 = smov [#allocation6]   ;;  %s406_s28 = scalar_lea.hbm %s624_s1, 4096 }
   0x3   :  { %s30_s25 = sshll.u32 %s500_s24, 4  ;;  %p407_p0 = scmp.ne.s32.totalorder %s624_s1, %s406_s28  ;;  %s31_s25 = int_to_ptr.vmem [resolvable:$true] %s30_s25 }
   0x4   :  { %p410_p1 = scmp.lt.u32.totalorder %s406_s28, %s624_s1 }
   0x6   :  { %p412_p2 = pnand %p410_p1, %p407_p0 }
   0x8   :  { %415 = shalt.err (!%p412_p2)
}
   0x9   :  { %s416_s10 = scalar_lea.vmem %s31_s25, 4096  ;;  %p421_p4 = scmp.lt.s32.totalorder %s31_s25, %s31_s25 }
   0xa   :  { %p417_p3 = scmp.ne.s32.totalorder %s31_s25, %s416_s10  ;;  %p422_p5 = scmp.lt.s32.totalorder %s416_s10, %s416_s10 }
   0xc   :  { %p423_p6 = por %p422_p5, %p421_p4 }
   0xe   :  { %p424_p7 = pnand %p423_p6, %p417_p3 }
  0x10   :  { %427 = shalt.err (!%p424_p7)
}
  0x11   :  { %s501_s11 = smov 256   ;;  %s502_s12 = smov 16  }
  0x12   :  { %36 = dma.hbm_to_vmem [thread:$0]  %s624_s1, 4096, %s31_s25, [#allocation7], %s501_s11, %s501_s11, %s502_s12  }
  0x13   :  { %s503_s15 = smov [#allocation3]   ;;  %s504_s17 = smov [#allocation8]  }
  0x14   :  { %s21_s16 = sshll.u32 %s503_s15, 4  ;;  %s42_s18 = sshll.u32 %s504_s17, 4  ;;  %s22_s16 = int_to_ptr.vmem [resolvable:$true] %s21_s16  ;;  %s43_s18 = int_to_ptr.vmem [resolvable:$true] %s42_s18 }
  0x15   :  { %s428_s21 = scalar_lea.hbm %s623_s0, 256 }
  0x16   :  { %p429_p8 = scmp.ne.s32.totalorder %s623_s0, %s428_s21  ;;  %p432_p9 = scmp.lt.u32.totalorder %s428_s21, %s623_s0 }
  0x18   :  { %p434_p10 = pnand %p432_p9, %p429_p8 }
  0x1a   :  { %437 = shalt.err (!%p434_p10)
}
  0x1b   :  { %s438_s1 = scalar_lea.vmem %s22_s16, 256  ;;  %p443_p12 = scmp.lt.s32.totalorder %s22_s16, %s22_s16 }
  0x1c   :  { %p439_p11 = scmp.ne.s32.totalorder %s22_s16, %s438_s1  ;;  %p444_p13 = scmp.lt.s32.totalorder %s438_s1, %s438_s1 }
  0x1e   :  { %p445_p0 = por %p444_p13, %p443_p12 }
  0x20   :  { %p446_p1 = pnand %p445_p0, %p439_p11 }
  0x22   :  { %449 = shalt.err (!%p446_p1)
}
  0x23   :  { %24 = dma.hbm_to_vmem [thread:$0]  %s623_s0, 256, %s22_s16, [#allocation4]  }
  0x24   :  { %s450_s30 = scalar_lea.hbm %s625_s2, 4096 }
  0x25   :  { %p451_p2 = scmp.ne.s32.totalorder %s625_s2, %s450_s30  ;;  %p454_p3 = scmp.lt.u32.totalorder %s450_s30, %s625_s2 }
  0x27   :  { %p456_p4 = pnand %p454_p3, %p451_p2 }
  0x29   :  { %459 = shalt.err (!%p456_p4)
}
  0x2a   :  { %s460_s14 = scalar_lea.vmem %s43_s18, 4096  ;;  %p465_p6 = scmp.lt.s32.totalorder %s43_s18, %s43_s18 }
  0x2b   :  { %p461_p5 = scmp.ne.s32.totalorder %s43_s18, %s460_s14  ;;  %p466_p7 = scmp.lt.s32.totalorder %s460_s14, %s460_s14 }
  0x2d   :  { %p467_p8 = por %p466_p7, %p465_p6 }
  0x2f   :  { %p468_p9 = pnand %p467_p8, %p461_p5 }
  0x31   :  { %471 = shalt.err (!%p468_p9)
}
  0x32   :  { %48 = dma.hbm_to_vmem [thread:$0]  %s625_s2, 4096, %s43_s18, [#allocation7], %s501_s11, %s501_s11, %s502_s12  }
  0x33   :  { %494 = dma.done.wait [#allocation4], 256  }
  0x34   :  { %495 = vsyncadd [#allocation4], 4294967040 }
  0x35   :  { %496 = dma.done.wait [#allocation7], 8192  }
  0x36   :  { %497 = vsyncadd [#allocation7], 4294959104  ;;  %v121_v0 = vld [vmem:[#allocation8 + $0x8] sm:$0xff]  ;;  %v123_v1 = vld [vmem:[#allocation8 + $0x18] sm:$0xff]  ;;  %v75_v30 = vlaneseq }
  0x37   :  { %v120_v2 = vld [vmem:[#allocation8] sm:$0xff]  ;;  %v336_v3 = vpack.c.bf16 %v123_v1, %v121_v0  ;;  %v122_v4 = vld [vmem:[#allocation8 + $0x10] sm:$0xff]  ;;  %v88_v5 = vld [vmem:[#allocation6 + $0x8] sm:$0xff] }
  0x38   :  { %v90_v6 = vld [vmem:[#allocation6 + $0x18] sm:$0xff]  ;;  %v338_v7 = vpack.c.bf16 %v122_v4, %v120_v2  ;;  %v87_v9 = vld [vmem:[#allocation6] sm:$0xff]  ;;  %v89_v10 = vld [vmem:[#allocation6 + $0x10] sm:$0xff]  ;;  %v588_v37 = vshrl.u32 %v75_v30, 7 }
  0x39   :  { %v368_v8 = vpack.c.bf16 %v90_v6, %v88_v5  ;;  %v125_v11 = vld [vmem:[#allocation8 + $0x28] sm:$0xff]  ;;  %337 = vmatprep.subr.bf16.mxu0 %v336_v3  ;;  %v370_v12 = vpack.c.bf16 %v89_v10, %v87_v9  ;;  %v127_v13 = vld [vmem:[#allocation8 + $0x38] sm:$0xff]  ;;  %v124_v17 = vld [vmem:[#allocation8 + $0x20] sm:$0xff] }
  0x3a   :  { %339 = vmatpush1.bf16.xpose.msra.mxu0 %v338_v7  ;;  %v340_v14 = vpack.c.bf16 %v127_v13, %v125_v11  ;;  %v92_v15 = vld [vmem:[#allocation6 + $0x28] sm:$0xff]  ;;  %v94_v16 = vld [vmem:[#allocation6 + $0x38] sm:$0xff]  ;;  %v126_v18 = vld [vmem:[#allocation8 + $0x30] sm:$0xff]  ;;  %v81_v44 = vsub.s32 1, %v588_v37 }
  0x3b   :  { %369 = vmatprep.subr.bf16.mxu1 %v368_v8  ;;  %v372_v19 = vpack.c.bf16 %v94_v16, %v92_v15  ;;  %v91_v20 = vld [vmem:[#allocation6 + $0x20] sm:$0xff]  ;;  %v93_v21 = vld [vmem:[#allocation6 + $0x30] sm:$0xff]  ;;  %v129_v22 = vld [vmem:[#allocation8 + $0x48] sm:$0xff]  ;;  %v342_v26 = vpack.c.bf16 %v126_v18, %v124_v17 }
  0x3c   :  { %371 = vmatpush1.bf16.xpose.msra.mxu1 %v370_v12  ;;  %341 = vmatprep.subr.bf16.mxu0 %v340_v14  ;;  %v131_v23 = vld [vmem:[#allocation8 + $0x58] sm:$0xff]  ;;  %v96_v24 = vld [vmem:[#allocation6 + $0x48] sm:$0xff]  ;;  %v374_v27 = vpack.c.bf16 %v93_v21, %v91_v20  ;;  %v128_v31 = vld [vmem:[#allocation8 + $0x40] sm:$0xff] }
  0x3d   :  { %373 = vmatprep.subr.bf16.mxu1 %v372_v19  ;;  %v98_v25 = vld [vmem:[#allocation6 + $0x58] sm:$0xff]  ;;  %v344_v28 = vpack.c.bf16 %v131_v23, %v129_v22  ;;  %v130_v32 = vld [vmem:[#allocation8 + $0x50] sm:$0xff]  ;;  %v95_v33 = vld [vmem:[#allocation6 + $0x40] sm:$0xff] }
  0x3e   :  { %v376_v29 = vpack.c.bf16 %v98_v25, %v96_v24  ;;  %v97_v34 = vld [vmem:[#allocation6 + $0x50] sm:$0xff]  ;;  %v133_v35 = vld [vmem:[#allocation8 + $0x68] sm:$0xff]  ;;  %v135_v36 = vld [vmem:[#allocation8 + $0x78] sm:$0xff]  ;;  %v346_v40 = vpack.c.bf16 %v130_v32, %v128_v31 }
  0x3f   :  { %v100_v38 = vld [vmem:[#allocation6 + $0x68] sm:$0xff]  ;;  %v102_v39 = vld [vmem:[#allocation6 + $0x78] sm:$0xff]  ;;  %v378_v41 = vpack.c.bf16 %v97_v34, %v95_v33  ;;  %v348_v42 = vpack.c.bf16 %v135_v36, %v133_v35  ;;  %v132_v45 = vld [vmem:[#allocation8 + $0x60] sm:$0xff] }
  0x40   :  { %v380_v43 = vpack.c.bf16 %v102_v39, %v100_v38  ;;  %v134_v46 = vld [vmem:[#allocation8 + $0x70] sm:$0xff]  ;;  %v99_v47 = vld [vmem:[#allocation6 + $0x60] sm:$0xff]  ;;  %v72_v48 = vld [vmem:[#allocation3 + $0x8] sm:$0xff]  ;;  %v77_v38 = vsub.s32 0, %v588_v37 }
  0x41   :  { %v594_v49 = vld [vmem:[%s626_s3] sm:$0x3]  ;;  %v137_v51 = vld [vmem:[#allocation8 + $0x88] sm:$0xff]  ;;  %v139_v52 = vld [vmem:[#allocation8 + $0x98] sm:$0xff]  ;;  %293 = vmatprep.mubr.f32.mxu1 %v72_v48  ;;  %v350_v56 = vpack.c.bf16 %v134_v46, %v132_v45 }
  0x42   :  { %343 = vmatpush1.bf16.xpose.msra.mxu0 %v342_v26  ;;  %v101_v50 = vld [vmem:[#allocation6 + $0x70] sm:$0xff]  ;;  %v82_v53 = vrot.slane %v594_v49, %v81_v44  ;;  %v104_v54 = vld [vmem:[#allocation6 + $0x88] sm:$0xff]  ;;  %v106_v55 = vld [vmem:[#allocation6 + $0x98] sm:$0xff]  ;;  %v352_v59 = vpack.c.bf16 %v139_v52, %v137_v51 }
  0x43   :  { %345 = vmatprep.subr.bf16.mxu0 %v344_v28  ;;  %v382_v58 = vpack.c.bf16 %v101_v50, %v99_v47  ;;  %v384_v60 = vpack.c.bf16 %v106_v55, %v104_v54  ;;  %v136_v61 = vld [vmem:[#allocation8 + $0x80] sm:$0xff]  ;;  %v138_v62 = vld [vmem:[#allocation8 + $0x90] sm:$0xff]  ;;  %v141_v1 = vld [vmem:[#allocation8 + $0xa8] sm:$0xff] }
  0x44   :  { %375 = vmatpush1.bf16.xpose.msra.mxu1 %v374_v27  ;;  %v86_v57 = vmul.f32 %v82_v53, %v72_v48  ;;  %v103_v63 = vld [vmem:[#allocation6 + $0x80] sm:$0xff]  ;;  %v105_v0 = vld [vmem:[#allocation6 + $0x90] sm:$0xff]  ;;  %v143_v2 = vld [vmem:[#allocation8 + $0xb8] sm:$0xff]  ;;  %v354_v5 = vpack.c.bf16 %v138_v62, %v136_v61 }
  0x45   :  { %377 = vmatprep.subr.bf16.mxu1 %v376_v29  ;;  %v108_v3 = vld [vmem:[#allocation6 + $0xa8] sm:$0xff]  ;;  %v110_v4 = vld [vmem:[#allocation6 + $0xb8] sm:$0xff]  ;;  %v386_v6 = vpack.c.bf16 %v105_v0, %v103_v63  ;;  %v356_v7 = vpack.c.bf16 %v143_v2, %v141_v1  ;;  %v140_v9 = vld [vmem:[#allocation8 + $0xa0] sm:$0xff] }
  0x46   :  { %216 = vmatprep.mubr.f32.mxu0 %v86_v57  ;;  %v388_v8 = vpack.c.bf16 %v110_v4, %v108_v3  ;;  %v142_v10 = vld [vmem:[#allocation8 + $0xb0] sm:$0xff]  ;;  %v107_v11 = vld [vmem:[#allocation6 + $0xa0] sm:$0xff]  ;;  %v145_v13 = vld [vmem:[#allocation8 + $0xc8] sm:$0xff] }
  0x47   :  { %v109_v12 = vld [vmem:[#allocation6 + $0xb0] sm:$0xff]  ;;  %v147_v14 = vld [vmem:[#allocation8 + $0xd8] sm:$0xff]  ;;  %v112_v15 = vld [vmem:[#allocation6 + $0xc8] sm:$0xff]  ;;  %v358_v17 = vpack.c.bf16 %v142_v10, %v140_v9 }
  0x48   :  { %v114_v16 = vld [vmem:[#allocation6 + $0xd8] sm:$0xff]  ;;  %v390_v18 = vpack.c.bf16 %v109_v12, %v107_v11  ;;  %v360_v19 = vpack.c.bf16 %v147_v14, %v145_v13  ;;  %v144_v21 = vld [vmem:[#allocation8 + $0xc0] sm:$0xff]  ;;  %v146_v22 = vld [vmem:[#allocation8 + $0xd0] sm:$0xff] }
  0x49   :  { %v392_v20 = vpack.c.bf16 %v114_v16, %v112_v15  ;;  %v111_v23 = vld [vmem:[#allocation6 + $0xc0] sm:$0xff]  ;;  %v113_v24 = vld [vmem:[#allocation6 + $0xd0] sm:$0xff]  ;;  %v149_v25 = vld [vmem:[#allocation8 + $0xe8] sm:$0xff]  ;;  %v362_v29 = vpack.c.bf16 %v146_v22, %v144_v21 }
  0x4a   :  { %347 = vmatpush1.bf16.xpose.msra.mxu0 %v346_v40  ;;  %v151_v26 = vld [vmem:[#allocation8 + $0xf8] sm:$0xff]  ;;  %v116_v27 = vld [vmem:[#allocation6 + $0xe8] sm:$0xff]  ;;  %v394_v30 = vpack.c.bf16 %v113_v24, %v111_v23  ;;  %v148_v33 = vld [vmem:[#allocation8 + $0xe0] sm:$0xff] }
  0x4b   :  { %349 = vmatprep.subr.bf16.mxu0 %v348_v42  ;;  %v118_v28 = vld [vmem:[#allocation6 + $0xf8] sm:$0xff]  ;;  %v364_v31 = vpack.c.bf16 %v151_v26, %v149_v25  ;;  %v150_v34 = vld [vmem:[#allocation8 + $0xf0] sm:$0xff]  ;;  %v115_v35 = vld [vmem:[#allocation6 + $0xe0] sm:$0xff] }
  0x4c   :  { %379 = vmatpush1.bf16.xpose.msra.mxu1 %v378_v41  ;;  %v396_v32 = vpack.c.bf16 %v118_v28, %v116_v27  ;;  %v117_v36 = vld [vmem:[#allocation6 + $0xf0] sm:$0xff]  ;;  %v366_v39 = vpack.c.bf16 %v150_v34, %v148_v33  ;;  %v78_v41 = vrot.slane %v594_v49, %v77_v38 }
  0x4d   :  { %381 = vmatprep.subr.bf16.mxu1 %v380_v43  ;;  %v398_v40 = vpack.c.bf16 %v117_v36, %v115_v35  ;;  %v71_v42 = vld [vmem:[#allocation3] sm:$0xff] }
  0x4e   :  { %v85_v43 = vmul.f32 %v78_v41, %v71_v42  ;;  %v306_v44 = vld [vmem:[%s629_s6] sm:$0x1]  ;;  %s505_s6 = smov [#allocation9]  }
  0x4f   :  { %v307_v45 = vld [vmem:[%s627_s4] sm:$0x1]  ;;  %s325_s22 = sshll.u32 %s505_s6, 4  ;;  %s326_s22 = int_to_ptr.vmem [resolvable:$true] %s325_s22 }
  0x50   :  { %v308_v46 = vmul.f32 %v307_v45, %v306_v44  ;;  %v305_v37 = vld [vmem:[%s628_s5] sm:$0x1]  ;;  %s472_s23 = scalar_lea.vmem %s326_s22, 128  ;;  %p477_p11 = scmp.lt.s32.totalorder %s326_s22, %s326_s22 }
  0x51   :  { %v335_v48 = vld [vmem:[%s627_s4] ss:$0 sm:$0xff]  ;;  %p473_p10 = scmp.ne.s32.totalorder %s326_s22, %s472_s23  ;;  %p478_p12 = scmp.lt.s32.totalorder %s472_s23, %s472_s23 }
  0x52   :  { %351 = vmatpush1.bf16.xpose.msra.mxu0 %v350_v56  ;;  %v309_v47 = vadd.f32 %v308_v46, %v305_v37 }
  0x53   :  { %353 = vmatprep.subr.bf16.mxu0 %v352_v59  ;;  %p479_p13 = por %p478_p12, %p477_p11 }
  0x54   :  { %383 = vmatpush1.bf16.xpose.msra.mxu1 %v382_v58  ;;  %v315_v53 = vrot.slane %v309_v47, %v77_v38 }
  0x55   :  { %385 = vmatprep.subr.bf16.mxu1 %v384_v60  ;;  %p480_p0 = pnand %p479_p13, %p473_p10 }
  0x5a   :  { %355 = vmatpush1.bf16.xpose.msra.mxu0 %v354_v5 }
  0x5b   :  { %357 = vmatprep.subr.bf16.mxu0 %v356_v7 }
  0x5c   :  { %387 = vmatpush1.bf16.xpose.msra.mxu1 %v386_v6 }
  0x5d   :  { %389 = vmatprep.subr.bf16.mxu1 %v388_v8 }
  0x62   :  { %359 = vmatpush1.bf16.xpose.msra.mxu0 %v358_v17 }
  0x63   :  { %361 = vmatprep.subr.bf16.mxu0 %v360_v19 }
  0x64   :  { %391 = vmatpush1.bf16.xpose.msra.mxu1 %v390_v18 }
  0x65   :  { %393 = vmatprep.subr.bf16.mxu1 %v392_v20 }
  0x6a   :  { %363 = vmatpush1.bf16.xpose.msra.mxu0 %v362_v29 }
  0x6b   :  { %365 = vmatprep.subr.bf16.mxu0 %v364_v31 }
  0x6c   :  { %395 = vmatpush1.bf16.xpose.msra.mxu1 %v394_v30 }
  0x6d   :  { %397 = vmatprep.subr.bf16.mxu1 %v396_v32 }
  0x72   :  { %367 = vmatpush1.bf16.xpose.msra.mxu0 %v366_v39 }
  0x74   :  { %399 = vmatpush1.bf16.xpose.msra.mxu1 %v398_v40 }
  0x79   :  { %217 = vmatmul.mubr.f32.vlgmr.msra.gmra.mrb[0].mxu0 %v85_v43 }
  0x7b   :  { %294 = vmatmul.mubr.f32.vlgmr.msra.gmra.mrb[0].mxu1 %v71_v42 }
 0x14c   :  { %v218_v49 = vpop.f32.mrb[0].mxu0 }
 0x14d   :  { %v228_v50 = vmul.f32 %v335_v48, %v218_v49  ;;  %v220_v51 = vpop.f32.mrb[1].mxu0 }
 0x14e   :  { %v295_v52 = vpop.f32.mrb[0].mxu1 }
 0x14f   :  { %v297_v54 = vpop.f32.mrb[1].mxu1  ;;  %v296_v55 = vadd.f32 %v295_v52, %v228_v50 }
 0x151   :  { %v317_v56 = vadd.f32 %v315_v53, %v296_v55 }
 0x153   :  { %318 = vst [vmem:[#allocation9] sm:$0xff] %v317_v56 }
 0x154   :  { %483 = shalt.err (!%p480_p0)
}
 0x155   :  { %s484_s24 = scalar_lea.hbm %s630_s7, 128 }
 0x156   :  { %p485_p1 = scmp.ne.s32.totalorder %s630_s7, %s484_s24  ;;  %p488_p2 = scmp.lt.u32.totalorder %s484_s24, %s630_s7 }
 0x158   :  { %p490_p3 = pnand %p488_p2, %p485_p1 }
 0x15a   :  { %493 = shalt.err (!%p490_p3)
}
 0x15b   :  { %328 = dma.vmem_to_hbm [thread:$0]  %s326_s22, 128, %s630_s7, [#allocation5]  }
 0x15c   :  { %498 = dma.done.wait [#allocation5], 128  }
 0x15d   :  { %499 = vsyncadd [#allocation5], 4294967168 }
 0x15e   :  { %332 = vsyncpa [#allocation4], 1 }
 0x15f   :  { %333 = vsyncpa [#allocation7], 1 }
 0x160   :  { %334 = vsyncpa [#allocation5], 1 }

</bundles_post_ra>
